<compile_context>
chip_gen: v5e
topology: v5e:2x2
jax: 0.10.0
libtpu: 0.0.40
codegen_flags: <defaults>
</compile_context>

<pallas_src>
import math

import jax
import jax.numpy as jnp
from jax import lax
from jax.experimental import pallas as pl
from jax.experimental.pallas import tpu as pltpu

INPUT_SIZE = 1
HIDDEN = 32          # small stand-in for hidden_layer_size=100; 4H = 128 is lane-dense
                     # TODO(synk): for the real H=100, pad H->128 / 4H->512 and mask the valid lanes.
OUTPUT_SIZE = 1
SEQ_LEN = 8
GATES = 4 * HIDDEN   # 128 = exactly one vreg lane width


def lstm_kernel(x_ref, wih_ref, whh_ref, b_ref, wlin_ref, blin_ref, out_ref, pre_ref):
    """Full LSTM recurrence + final Linear, fused in one kernel invocation.

    x_ref    : (S, 1)        input sequence
    wih_ref  : (1, 4H)       fused input->gate weights, gate order [i, f, o, g]
    whh_ref  : (H, 4H)       fused hidden->gate weights, same order
    b_ref    : (1, 4H)       combined bias (b_ih + b_hh)
    wlin_ref : (1, H)        final Linear weight row
    blin_ref : (1, out)      final Linear bias
    out_ref  : (1, out)      predictions[-1]
    pre_ref  : (S, 4H) VMEM scratch for the hoisted input projection
    """
    H = HIDDEN

    # Hoist the K=1 input projection + bias out of the recurrence.
    # No recurrent dependency -> one VPU broadcast-multiply for all S steps
    # instead of 4 degenerate MXU matmuls + 4 bias adds per step.
    pre_ref[...] = x_ref[...] * wih_ref[...] + b_ref[...]          # (S, 4H)

    # Hoist the recurrent weight load out of the loop (load once, reuse 8x).
    whh = whh_ref[...]                                             # (H, 4H)

    def step(t, carry):
        h, c = carry
        # Single lane-dense (1,H)x(H,4H) MXU matmul produces all four gates.
        gates = (pre_ref[pl.ds(t, 1), :]
                 + jnp.dot(h, whh, preferred_element_type=jnp.float32))   # (1, 4H)
        # Two EUP issues per step: one sigmoid over (1,3H), one tanh over (1,H).
        sig = jax.nn.sigmoid(gates[:, :3 * H])
        g_g = jnp.tanh(gates[:, 3 * H:])
        i_g = sig[:, 0 * H:1 * H]
        f_g = sig[:, 1 * H:2 * H]
        o_g = sig[:, 2 * H:3 * H]
        c_new = f_g * c + i_g * g_g
        h_new = o_g * jnp.tanh(c_new)
        return (h_new, c_new)

    h0 = jnp.zeros((1, H), jnp.float32)
    c0 = jnp.zeros((1, H), jnp.float32)
    # SEQ_LEN is small & static: fully unroll for LLO scheduler visibility.
    h_final, _ = lax.fori_loop(0, SEQ_LEN, step, (h0, c0), unroll=True)

    # Final N=1 Linear on the last hidden state: VPU multiply + XLU reduce
    # instead of paying MXU push/drain latency for 32 MACs.
    out_ref[...] = (jnp.sum(h_final * wlin_ref[...], axis=-1, keepdims=True)
                    + blin_ref[...])


def lstm_forward(input_seq, wih_k, whh_k, b_k, wlin_k, blin_k):
    """Wrapper: input_seq is 1-D (S,). Returns shape (output_size,) = predictions[-1]."""
    x = input_seq.reshape(SEQ_LEN, INPUT_SIZE).astype(jnp.float32)
    vmem = pl.BlockSpec(memory_space=pltpu.MemorySpace.VMEM)
    # Everything fits in ~20 KB of VMEM: no grid, no tiling, no pipelining.
    out = pl.pallas_call(
        lstm_kernel,
        out_shape=jax.ShapeDtypeStruct((1, OUTPUT_SIZE), jnp.float32),
        in_specs=[vmem] * 6,
        out_specs=vmem,
        scratch_shapes=[pltpu.VMEM((SEQ_LEN, GATES), jnp.float32)],
    )(x, wih_k, whh_k, b_k, wlin_k, blin_k)
    return out[0]


def lstm_reference(input_seq, w_ih, w_hh, b_ih, b_hh, w_lin, b_lin):
    """Pure-JAX reference mirroring torch.nn.LSTM + Linear + predictions[-1]."""
    H = w_hh.shape[1]
    x = input_seq.reshape(SEQ_LEN, INPUT_SIZE).astype(jnp.float32)

    def step(carry, x_t):
        h, c = carry
        gates = w_ih @ x_t + b_ih + w_hh @ h + b_hh
        i = jax.nn.sigmoid(gates[0:H])
        f = jax.nn.sigmoid(gates[H:2 * H])
        g = jnp.tanh(gates[2 * H:3 * H])
        o = jax.nn.sigmoid(gates[3 * H:4 * H])
        c = f * c + i * g
        h = o * jnp.tanh(c)
        return (h, c), h

    (h, c), hs = jax.lax.scan(step, (jnp.zeros((H,)), jnp.zeros((H,))), x)
    preds = hs @ w_lin.T + b_lin
    return preds[-1]


def init_params(key):
    """Deterministic PyTorch-style init: U(-1/sqrt(H), 1/sqrt(H)), gate order i,f,g,o."""
    k = 1.0 / math.sqrt(HIDDEN)
    keys = jax.random.split(key, 6)
    w_ih = jax.random.uniform(keys[0], (4 * HIDDEN, INPUT_SIZE), jnp.float32, -k, k)
    w_hh = jax.random.uniform(keys[1], (4 * HIDDEN, HIDDEN), jnp.float32, -k, k)
    b_ih = jax.random.uniform(keys[2], (4 * HIDDEN,), jnp.float32, -k, k)
    b_hh = jax.random.uniform(keys[3], (4 * HIDDEN,), jnp.float32, -k, k)
    w_lin = jax.random.uniform(keys[4], (OUTPUT_SIZE, HIDDEN), jnp.float32, -k, k)
    b_lin = jax.random.uniform(keys[5], (OUTPUT_SIZE,), jnp.float32, -k, k)
    return w_ih, w_hh, b_ih, b_hh, w_lin, b_lin


def pack_params_for_kernel(w_ih, w_hh, b_ih, b_hh, w_lin, b_lin):
    """Fuse gates into one lane-dense 4H axis, reordered [i, f, o, g]."""
    H = HIDDEN
    # PyTorch row order is [i, f, g, o]; put the three sigmoid gates first.
    perm = jnp.concatenate([
        jnp.arange(0, H),            # i
        jnp.arange(H, 2 * H),        # f
        jnp.arange(3 * H, 4 * H),    # o
        jnp.arange(2 * H, 3 * H),    # g
    ])
    wih_k = w_ih[perm].T                               # (input_size, 4H) = (1, 128)
    whh_k = w_hh[perm].T                               # (H, 4H)        = (32, 128)
    b_k = (b_ih + b_hh)[perm].reshape(1, 4 * H)        # (1, 4H)
    wlin_k = w_lin.reshape(1, HIDDEN)                  # (1, H) single output row
    blin_k = b_lin.reshape(1, OUTPUT_SIZE)             # (1, out)
    return wih_k, whh_k, b_k, wlin_k, blin_k


if __name__ == "__main__":
    key = jax.random.PRNGKey(0)
    pkey, xkey = jax.random.split(key)

    w_ih, w_hh, b_ih, b_hh, w_lin, b_lin = init_params(pkey)
    wih_k, whh_k, b_k, wlin_k, blin_k = pack_params_for_kernel(
        w_ih, w_hh, b_ih, b_hh, w_lin, b_lin)

    input_seq = jax.random.normal(xkey, (SEQ_LEN,), jnp.float32)

    out = lstm_forward(input_seq, wih_k, whh_k, b_k, wlin_k, blin_k)
    out = jax.block_until_ready(out)

    ref = jax.block_until_ready(
        lstm_reference(input_seq, w_ih, w_hh, b_ih, b_hh, w_lin, b_lin))

    assert out.shape == (OUTPUT_SIZE,)
    assert jnp.allclose(out, ref, atol=1e-5, rtol=1e-5), (out, ref)
    print("KERNEL_OK")
</pallas_src>

<mosaic_0001>
module attributes {stable_mosaic.version = 11 : i64} {
  func.func @lstm_kernel(%arg0: memref<8x1xf32, #tpu.memory_space<vmem>>, %arg1: memref<1x128xf32, #tpu.memory_space<vmem>>, %arg2: memref<32x128xf32, #tpu.memory_space<vmem>>, %arg3: memref<1x128xf32, #tpu.memory_space<vmem>>, %arg4: memref<1x32xf32, #tpu.memory_space<vmem>>, %arg5: memref<1x1xf32, #tpu.memory_space<vmem>>, %arg6: memref<1x1xf32, #tpu.memory_space<vmem>>, %arg7: memref<8x128xf32, #tpu.memory_space<vmem>>) attributes {dimension_semantics = [], scalar_prefetch = 0 : i64, scratch_operands = 1 : i64, tpu.core_type = #tpu.core_type<tc>} {
    %c0 = arith.constant 0 : index
    %c0_0 = arith.constant 0 : index
    %0 = vector.load %arg0[%c0, %c0_0] : memref<8x1xf32, #tpu.memory_space<vmem>>, vector<8x1xf32>
    %c0_1 = arith.constant 0 : index
    %c0_2 = arith.constant 0 : index
    %1 = vector.load %arg1[%c0_1, %c0_2] : memref<1x128xf32, #tpu.memory_space<vmem>>, vector<1x128xf32>
    %2 = vector.broadcast %0 : vector<8x1xf32> to vector<8x128xf32>
    %3 = vector.broadcast %1 : vector<1x128xf32> to vector<8x128xf32>
    %4 = arith.mulf %2, %3 : vector<8x128xf32>
    %c0_3 = arith.constant 0 : index
    %c0_4 = arith.constant 0 : index
    %5 = vector.load %arg3[%c0_3, %c0_4] : memref<1x128xf32, #tpu.memory_space<vmem>>, vector<1x128xf32>
    %6 = vector.broadcast %5 : vector<1x128xf32> to vector<8x128xf32>
    %7 = arith.addf %4, %6 : vector<8x128xf32>
    %c0_5 = arith.constant 0 : index
    %c0_6 = arith.constant 0 : index
    %8 = vector.load %arg7[%c0_5, %c0_6] : memref<8x128xf32, #tpu.memory_space<vmem>>, vector<8x128xf32>
    tpu.vector_store %arg7[%c0_5, %c0_6], %7 {strides = array<i32>} : memref<8x128xf32, #tpu.memory_space<vmem>>, vector<8x128xf32>,
    %c0_7 = arith.constant 0 : index
    %c0_8 = arith.constant 0 : index
    %9 = vector.load %arg2[%c0_7, %c0_8] : memref<32x128xf32, #tpu.memory_space<vmem>>, vector<32x128xf32>
    %cst = arith.constant 0.000000e+00 : f32
    %10 = vector.broadcast %cst : f32 to vector<1x32xf32>
    %cst_9 = arith.constant 0.000000e+00 : f32
    %11 = vector.broadcast %cst_9 : f32 to vector<1x32xf32>
    %c0_i32 = arith.constant 0 : i32
    %12 = arith.index_cast %c0_i32 : i32 to index
    %c0_10 = arith.constant 0 : index
    %13 = vector.load %arg7[%12, %c0_10] : memref<8x128xf32, #tpu.memory_space<vmem>>, vector<1x128xf32>
    %cst_11 = arith.constant dense<0.000000e+00> : vector<1x128xf32>
    %14 = tpu.matmul %10, %9, %cst_11 {dimension_numbers = #tpu.dot_dimension_numbers<[1], [0], [0], [1], [0, 0, 1, 1], [], []>} : vector<1x32xf32>, vector<32x128xf32>, vector<1x128xf32> -> vector<1x128xf32>
    %15 = arith.addf %13, %14 : vector<1x128xf32>
    %16 = vector.extract_strided_slice %15 {offsets = [0, 0], sizes = [1, 96], strides = [1, 1]} : vector<1x128xf32> to vector<1x96xf32>
    %17 = arith.negf %16 : vector<1x96xf32>
    %18 = math.exp %17 : vector<1x96xf32>
    %cst_12 = arith.constant 1.000000e+00 : f32
    %19 = vector.broadcast %cst_12 : f32 to vector<1x96xf32>
    %20 = arith.addf %19, %18 : vector<1x96xf32>
    %21 = arith.divf %19, %20 : vector<1x96xf32>
    %22 = vector.extract_strided_slice %15 {offsets = [0, 96], sizes = [1, 32], strides = [1, 1]} : vector<1x128xf32> to vector<1x32xf32>
    %23 = math.tanh %22 : vector<1x32xf32>
    %24 = vector.extract_strided_slice %21 {offsets = [0, 0], sizes = [1, 32], strides = [1, 1]} : vector<1x96xf32> to vector<1x32xf32>
    %25 = vector.extract_strided_slice %21 {offsets = [0, 32], sizes = [1, 32], strides = [1, 1]} : vector<1x96xf32> to vector<1x32xf32>
    %26 = vector.extract_strided_slice %21 {offsets = [0, 64], sizes = [1, 32], strides = [1, 1]} : vector<1x96xf32> to vector<1x32xf32>
    %27 = arith.mulf %25, %11 : vector<1x32xf32>
    %28 = arith.mulf %24, %23 : vector<1x32xf32>
    %29 = arith.addf %27, %28 : vector<1x32xf32>
    %30 = math.tanh %29 : vector<1x32xf32>
    %31 = arith.mulf %26, %30 : vector<1x32xf32>
    %c1_i32 = arith.constant 1 : i32
    %32 = arith.index_cast %c1_i32 : i32 to index
    %c0_13 = arith.constant 0 : index
    %33 = vector.load %arg7[%32, %c0_13] : memref<8x128xf32, #tpu.memory_space<vmem>>, vector<1x128xf32>
    %cst_14 = arith.constant dense<0.000000e+00> : vector<1x128xf32>
    %34 = tpu.matmul %31, %9, %cst_14 {dimension_numbers = #tpu.dot_dimension_numbers<[1], [0], [0], [1], [0, 0, 1, 1], [], []>} : vector<1x32xf32>, vector<32x128xf32>, vector<1x128xf32> -> vector<1x128xf32>
    %35 = arith.addf %33, %34 : vector<1x128xf32>
    %36 = vector.extract_strided_slice %35 {offsets = [0, 0], sizes = [1, 96], strides = [1, 1]} : vector<1x128xf32> to vector<1x96xf32>
    %37 = arith.negf %36 : vector<1x96xf32>
    %38 = math.exp %37 : vector<1x96xf32>
    %cst_15 = arith.constant 1.000000e+00 : f32
    %39 = vector.broadcast %cst_15 : f32 to vector<1x96xf32>
    %40 = arith.addf %39, %38 : vector<1x96xf32>
    %41 = arith.divf %39, %40 : vector<1x96xf32>
    %42 = vector.extract_strided_slice %35 {offsets = [0, 96], sizes = [1, 32], strides = [1, 1]} : vector<1x128xf32> to vector<1x32xf32>
    %43 = math.tanh %42 : vector<1x32xf32>
    %44 = vector.extract_strided_slice %41 {offsets = [0, 0], sizes = [1, 32], strides = [1, 1]} : vector<1x96xf32> to vector<1x32xf32>
    %45 = vector.extract_strided_slice %41 {offsets = [0, 32], sizes = [1, 32], strides = [1, 1]} : vector<1x96xf32> to vector<1x32xf32>
    %46 = vector.extract_strided_slice %41 {offsets = [0, 64], sizes = [1, 32], strides = [1, 1]} : vector<1x96xf32> to vector<1x32xf32>
    %47 = arith.mulf %45, %29 : vector<1x32xf32>
    %48 = arith.mulf %44, %43 : vector<1x32xf32>
    %49 = arith.addf %47, %48 : vector<1x32xf32>
    %50 = math.tanh %49 : vector<1x32xf32>
    %51 = arith.mulf %46, %50 : vector<1x32xf32>
    %c2_i32 = arith.constant 2 : i32
    %52 = arith.index_cast %c2_i32 : i32 to index
    %c0_16 = arith.constant 0 : index
    %53 = vector.load %arg7[%52, %c0_16] : memref<8x128xf32, #tpu.memory_space<vmem>>, vector<1x128xf32>
    %cst_17 = arith.constant dense<0.000000e+00> : vector<1x128xf32>
    %54 = tpu.matmul %51, %9, %cst_17 {dimension_numbers = #tpu.dot_dimension_numbers<[1], [0], [0], [1], [0, 0, 1, 1], [], []>} : vector<1x32xf32>, vector<32x128xf32>, vector<1x128xf32> -> vector<1x128xf32>
    %55 = arith.addf %53, %54 : vector<1x128xf32>
    %56 = vector.extract_strided_slice %55 {offsets = [0, 0], sizes = [1, 96], strides = [1, 1]} : vector<1x128xf32> to vector<1x96xf32>
    %57 = arith.negf %56 : vector<1x96xf32>
    %58 = math.exp %57 : vector<1x96xf32>
    %cst_18 = arith.constant 1.000000e+00 : f32
    %59 = vector.broadcast %cst_18 : f32 to vector<1x96xf32>
    %60 = arith.addf %59, %58 : vector<1x96xf32>
    %61 = arith.divf %59, %60 : vector<1x96xf32>
    %62 = vector.extract_strided_slice %55 {offsets = [0, 96], sizes = [1, 32], strides = [1, 1]} : vector<1x128xf32> to vector<1x32xf32>
    %63 = math.tanh %62 : vector<1x32xf32>
    %64 = vector.extract_strided_slice %61 {offsets = [0, 0], sizes = [1, 32], strides = [1, 1]} : vector<1x96xf32> to vector<1x32xf32>
    %65 = vector.extract_strided_slice %61 {offsets = [0, 32], sizes = [1, 32], strides = [1, 1]} : vector<1x96xf32> to vector<1x32xf32>
    %66 = vector.extract_strided_slice %61 {offsets = [0, 64], sizes = [1, 32], strides = [1, 1]} : vector<1x96xf32> to vector<1x32xf32>
    %67 = arith.mulf %65, %49 : vector<1x32xf32>
    %68 = arith.mulf %64, %63 : vector<1x32xf32>
    %69 = arith.addf %67, %68 : vector<1x32xf32>
    %70 = math.tanh %69 : vector<1x32xf32>
    %71 = arith.mulf %66, %70 : vector<1x32xf32>
    %c3_i32 = arith.constant 3 : i32
    %72 = arith.index_cast %c3_i32 : i32 to index
    %c0_19 = arith.constant 0 : index
    %73 = vector.load %arg7[%72, %c0_19] : memref<8x128xf32, #tpu.memory_space<vmem>>, vector<1x128xf32>
    %cst_20 = arith.constant dense<0.000000e+00> : vector<1x128xf32>
    %74 = tpu.matmul %71, %9, %cst_20 {dimension_numbers = #tpu.dot_dimension_numbers<[1], [0], [0], [1], [0, 0, 1, 1], [], []>} : vector<1x32xf32>, vector<32x128xf32>, vector<1x128xf32> -> vector<1x128xf32>
    %75 = arith.addf %73, %74 : vector<1x128xf32>
    %76 = vector.extract_strided_slice %75 {offsets = [0, 0], sizes = [1, 96], strides = [1, 1]} : vector<1x128xf32> to vector<1x96xf32>
    %77 = arith.negf %76 : vector<1x96xf32>
    %78 = math.exp %77 : vector<1x96xf32>
    %cst_21 = arith.constant 1.000000e+00 : f32
    %79 = vector.broadcast %cst_21 : f32 to vector<1x96xf32>
    %80 = arith.addf %79, %78 : vector<1x96xf32>
    %81 = arith.divf %79, %80 : vector<1x96xf32>
    %82 = vector.extract_strided_slice %75 {offsets = [0, 96], sizes = [1, 32], strides = [1, 1]} : vector<1x128xf32> to vector<1x32xf32>
    %83 = math.tanh %82 : vector<1x32xf32>
    %84 = vector.extract_strided_slice %81 {offsets = [0, 0], sizes = [1, 32], strides = [1, 1]} : vector<1x96xf32> to vector<1x32xf32>
    %85 = vector.extract_strided_slice %81 {offsets = [0, 32], sizes = [1, 32], strides = [1, 1]} : vector<1x96xf32> to vector<1x32xf32>
    %86 = vector.extract_strided_slice %81 {offsets = [0, 64], sizes = [1, 32], strides = [1, 1]} : vector<1x96xf32> to vector<1x32xf32>
    %87 = arith.mulf %85, %69 : vector<1x32xf32>
    %88 = arith.mulf %84, %83 : vector<1x32xf32>
    %89 = arith.addf %87, %88 : vector<1x32xf32>
    %90 = math.tanh %89 : vector<1x32xf32>
    %91 = arith.mulf %86, %90 : vector<1x32xf32>
    %c4_i32 = arith.constant 4 : i32
    %92 = arith.index_cast %c4_i32 : i32 to index
    %c0_22 = arith.constant 0 : index
    %93 = vector.load %arg7[%92, %c0_22] : memref<8x128xf32, #tpu.memory_space<vmem>>, vector<1x128xf32>
    %cst_23 = arith.constant dense<0.000000e+00> : vector<1x128xf32>
    %94 = tpu.matmul %91, %9, %cst_23 {dimension_numbers = #tpu.dot_dimension_numbers<[1], [0], [0], [1], [0, 0, 1, 1], [], []>} : vector<1x32xf32>, vector<32x128xf32>, vector<1x128xf32> -> vector<1x128xf32>
    %95 = arith.addf %93, %94 : vector<1x128xf32>
    %96 = vector.extract_strided_slice %95 {offsets = [0, 0], sizes = [1, 96], strides = [1, 1]} : vector<1x128xf32> to vector<1x96xf32>
    %97 = arith.negf %96 : vector<1x96xf32>
    %98 = math.exp %97 : vector<1x96xf32>
    %cst_24 = arith.constant 1.000000e+00 : f32
    %99 = vector.broadcast %cst_24 : f32 to vector<1x96xf32>
    %100 = arith.addf %99, %98 : vector<1x96xf32>
    %101 = arith.divf %99, %100 : vector<1x96xf32>
    %102 = vector.extract_strided_slice %95 {offsets = [0, 96], sizes = [1, 32], strides = [1, 1]} : vector<1x128xf32> to vector<1x32xf32>
    %103 = math.tanh %102 : vector<1x32xf32>
    %104 = vector.extract_strided_slice %101 {offsets = [0, 0], sizes = [1, 32], strides = [1, 1]} : vector<1x96xf32> to vector<1x32xf32>
    %105 = vector.extract_strided_slice %101 {offsets = [0, 32], sizes = [1, 32], strides = [1, 1]} : vector<1x96xf32> to vector<1x32xf32>
    %106 = vector.extract_strided_slice %101 {offsets = [0, 64], sizes = [1, 32], strides = [1, 1]} : vector<1x96xf32> to vector<1x32xf32>
    %107 = arith.mulf %105, %89 : vector<1x32xf32>
    %108 = arith.mulf %104, %103 : vector<1x32xf32>
    %109 = arith.addf %107, %108 : vector<1x32xf32>
    %110 = math.tanh %109 : vector<1x32xf32>
    %111 = arith.mulf %106, %110 : vector<1x32xf32>
    %c5_i32 = arith.constant 5 : i32
    %112 = arith.index_cast %c5_i32 : i32 to index
    %c0_25 = arith.constant 0 : index
    %113 = vector.load %arg7[%112, %c0_25] : memref<8x128xf32, #tpu.memory_space<vmem>>, vector<1x128xf32>
    %cst_26 = arith.constant dense<0.000000e+00> : vector<1x128xf32>
    %114 = tpu.matmul %111, %9, %cst_26 {dimension_numbers = #tpu.dot_dimension_numbers<[1], [0], [0], [1], [0, 0, 1, 1], [], []>} : vector<1x32xf32>, vector<32x128xf32>, vector<1x128xf32> -> vector<1x128xf32>
    %115 = arith.addf %113, %114 : vector<1x128xf32>
    %116 = vector.extract_strided_slice %115 {offsets = [0, 0], sizes = [1, 96], strides = [1, 1]} : vector<1x128xf32> to vector<1x96xf32>
    %117 = arith.negf %116 : vector<1x96xf32>
    %118 = math.exp %117 : vector<1x96xf32>
    %cst_27 = arith.constant 1.000000e+00 : f32
    %119 = vector.broadcast %cst_27 : f32 to vector<1x96xf32>
    %120 = arith.addf %119, %118 : vector<1x96xf32>
    %121 = arith.divf %119, %120 : vector<1x96xf32>
    %122 = vector.extract_strided_slice %115 {offsets = [0, 96], sizes = [1, 32], strides = [1, 1]} : vector<1x128xf32> to vector<1x32xf32>
    %123 = math.tanh %122 : vector<1x32xf32>
    %124 = vector.extract_strided_slice %121 {offsets = [0, 0], sizes = [1, 32], strides = [1, 1]} : vector<1x96xf32> to vector<1x32xf32>
    %125 = vector.extract_strided_slice %121 {offsets = [0, 32], sizes = [1, 32], strides = [1, 1]} : vector<1x96xf32> to vector<1x32xf32>
    %126 = vector.extract_strided_slice %121 {offsets = [0, 64], sizes = [1, 32], strides = [1, 1]} : vector<1x96xf32> to vector<1x32xf32>
    %127 = arith.mulf %125, %109 : vector<1x32xf32>
    %128 = arith.mulf %124, %123 : vector<1x32xf32>
    %129 = arith.addf %127, %128 : vector<1x32xf32>
    %130 = math.tanh %129 : vector<1x32xf32>
    %131 = arith.mulf %126, %130 : vector<1x32xf32>
    %c6_i32 = arith.constant 6 : i32
    %132 = arith.index_cast %c6_i32 : i32 to index
    %c0_28 = arith.constant 0 : index
    %133 = vector.load %arg7[%132, %c0_28] : memref<8x128xf32, #tpu.memory_space<vmem>>, vector<1x128xf32>
    %cst_29 = arith.constant dense<0.000000e+00> : vector<1x128xf32>
    %134 = tpu.matmul %131, %9, %cst_29 {dimension_numbers = #tpu.dot_dimension_numbers<[1], [0], [0], [1], [0, 0, 1, 1], [], []>} : vector<1x32xf32>, vector<32x128xf32>, vector<1x128xf32> -> vector<1x128xf32>
    %135 = arith.addf %133, %134 : vector<1x128xf32>
    %136 = vector.extract_strided_slice %135 {offsets = [0, 0], sizes = [1, 96], strides = [1, 1]} : vector<1x128xf32> to vector<1x96xf32>
    %137 = arith.negf %136 : vector<1x96xf32>
    %138 = math.exp %137 : vector<1x96xf32>
    %cst_30 = arith.constant 1.000000e+00 : f32
    %139 = vector.broadcast %cst_30 : f32 to vector<1x96xf32>
    %140 = arith.addf %139, %138 : vector<1x96xf32>
    %141 = arith.divf %139, %140 : vector<1x96xf32>
    %142 = vector.extract_strided_slice %135 {offsets = [0, 96], sizes = [1, 32], strides = [1, 1]} : vector<1x128xf32> to vector<1x32xf32>
    %143 = math.tanh %142 : vector<1x32xf32>
    %144 = vector.extract_strided_slice %141 {offsets = [0, 0], sizes = [1, 32], strides = [1, 1]} : vector<1x96xf32> to vector<1x32xf32>
    %145 = vector.extract_strided_slice %141 {offsets = [0, 32], sizes = [1, 32], strides = [1, 1]} : vector<1x96xf32> to vector<1x32xf32>
    %146 = vector.extract_strided_slice %141 {offsets = [0, 64], sizes = [1, 32], strides = [1, 1]} : vector<1x96xf32> to vector<1x32xf32>
    %147 = arith.mulf %145, %129 : vector<1x32xf32>
    %148 = arith.mulf %144, %143 : vector<1x32xf32>
    %149 = arith.addf %147, %148 : vector<1x32xf32>
    %150 = math.tanh %149 : vector<1x32xf32>
    %151 = arith.mulf %146, %150 : vector<1x32xf32>
    %c7_i32 = arith.constant 7 : i32
    %152 = arith.index_cast %c7_i32 : i32 to index
    %c0_31 = arith.constant 0 : index
    %153 = vector.load %arg7[%152, %c0_31] : memref<8x128xf32, #tpu.memory_space<vmem>>, vector<1x128xf32>
    %cst_32 = arith.constant dense<0.000000e+00> : vector<1x128xf32>
    %154 = tpu.matmul %151, %9, %cst_32 {dimension_numbers = #tpu.dot_dimension_numbers<[1], [0], [0], [1], [0, 0, 1, 1], [], []>} : vector<1x32xf32>, vector<32x128xf32>, vector<1x128xf32> -> vector<1x128xf32>
    %155 = arith.addf %153, %154 : vector<1x128xf32>
    %156 = vector.extract_strided_slice %155 {offsets = [0, 0], sizes = [1, 96], strides = [1, 1]} : vector<1x128xf32> to vector<1x96xf32>
    %157 = arith.negf %156 : vector<1x96xf32>
    %158 = math.exp %157 : vector<1x96xf32>
    %cst_33 = arith.constant 1.000000e+00 : f32
    %159 = vector.broadcast %cst_33 : f32 to vector<1x96xf32>
    %160 = arith.addf %159, %158 : vector<1x96xf32>
    %161 = arith.divf %159, %160 : vector<1x96xf32>
    %162 = vector.extract_strided_slice %155 {offsets = [0, 96], sizes = [1, 32], strides = [1, 1]} : vector<1x128xf32> to vector<1x32xf32>
    %163 = math.tanh %162 : vector<1x32xf32>
    %164 = vector.extract_strided_slice %161 {offsets = [0, 0], sizes = [1, 32], strides = [1, 1]} : vector<1x96xf32> to vector<1x32xf32>
    %165 = vector.extract_strided_slice %161 {offsets = [0, 32], sizes = [1, 32], strides = [1, 1]} : vector<1x96xf32> to vector<1x32xf32>
    %166 = vector.extract_strided_slice %161 {offsets = [0, 64], sizes = [1, 32], strides = [1, 1]} : vector<1x96xf32> to vector<1x32xf32>
    %167 = arith.mulf %165, %149 : vector<1x32xf32>
    %168 = arith.mulf %164, %163 : vector<1x32xf32>
    %169 = arith.addf %167, %168 : vector<1x32xf32>
    %170 = math.tanh %169 : vector<1x32xf32>
    %171 = arith.mulf %166, %170 : vector<1x32xf32>
    %c8_i32 = arith.constant 8 : i32
    %c0_34 = arith.constant 0 : index
    %c0_35 = arith.constant 0 : index
    %172 = vector.load %arg4[%c0_34, %c0_35] : memref<1x32xf32, #tpu.memory_space<vmem>>, vector<1x32xf32>
    %173 = arith.mulf %171, %172 : vector<1x32xf32>
    %cst_36 = arith.constant dense<0.000000e+00> : vector<1xf32>
    %174 = vector.multi_reduction <add>, %173, %cst_36 [1] : vector<1x32xf32> to vector<1xf32>
    %175 = vector.shape_cast %174 : vector<1xf32> to vector<1x1xf32>
    %c0_37 = arith.constant 0 : index
    %c0_38 = arith.constant 0 : index
    %176 = vector.load %arg5[%c0_37, %c0_38] : memref<1x1xf32, #tpu.memory_space<vmem>>, vector<1x1xf32>
    %177 = arith.addf %175, %176 : vector<1x1xf32>
    %c0_39 = arith.constant 0 : index
    %c0_40 = arith.constant 0 : index
    %178 = vector.load %arg6[%c0_39, %c0_40] : memref<1x1xf32, #tpu.memory_space<vmem>>, vector<1x1xf32>
    tpu.vector_store %arg6[%c0_39, %c0_40], %177 {strides = array<i32>} : memref<1x1xf32, #tpu.memory_space<vmem>>, vector<1x1xf32>,
    return
  }
}

</mosaic_0001>

<bundles_post_ra>
// kernel: tpu_custom_call.1
= control target key start
LH: loop header
LB: loop body
LE: loop exit
PB: predicated region body
PF: predicated region fallthrough
CT: control target
= control target key end

     0   :  { %s857_s0 = inlined_call_operand.vmem [shape: f32[8,1], index: 0, kind: input, shape index: {}]   ;;  %s858_s1 = inlined_call_operand.vmem [shape: f32[1,128], index: 1, kind: input, shape index: {}]   ;;  %s859_s2 = inlined_call_operand.hbm [shape: f32[32,128], index: 2, kind: input, shape index: {}]   ;;  %s860_s3 = inlined_call_operand.vmem [shape: f32[1,128], index: 3, kind: input, shape index: {}]   ;;  %s861_s4 = inlined_call_operand.vmem [shape: f32[1,32], index: 4, kind: input, shape index: {}]   ;;  %s862_s5 = inlined_call_operand.<no memory space> [shape: f32[1,1], index: 5, kind: input, shape index: {}]   ;;  %s863_s6 = inlined_call_operand.hbm [shape: f32[1,1], index: 6, kind: output, shape index: {}]  }
   0x1   :  { %v11_v0 = vstv %s862_s5 }
   0x2   :  { %12 = vst [vmem:[#allocation3] sm:$0x1] %v11_v0 }
   0x3   :  { %13 = vsyncpa [#allocation5], 0 }
   0x4   :  { %14 = vsyncpa [#allocation6], 0  ;;  %s23_s25 = sshll.u32 %s859_s2, 4  ;;  %s753_s26 = smov [#allocation4]   ;;  %s24_s25 = int_to_ptr.hbm [resolvable:$true] %s23_s25 }
   0x5   :  { %s25_s27 = sshll.u32 %s753_s26, 4  ;;  %s754_s28 = smov 128   ;;  %s26_s27 = int_to_ptr.vmem [resolvable:$true] %s25_s27 }
   0x6   :  { %s755_s29 = smov 8  }
   0x7   :  { %31 = dma.hbm_to_vmem [thread:$0]  %s24_s25, 512, %s26_s27, [#allocation5], %s754_s28, %s754_s28, %s755_s29  }
   0x8   :  { %749 = dma.done.wait [#allocation5], 512  }
   0x9   :  { %750 = vsyncadd [#allocation5], 4294966784  ;;  %v756_v1 = vmov 0   ;;  %v62_v2 = vld [vmem:[#allocation4 + $0x18] sm:$0xff]  ;;  %v61_v3 = vld [vmem:[#allocation4 + $0x10] sm:$0xff]  ;;  %v757_v7 = vmov 0.0  }
   0xa   :  { %633 = vset.pattern.permute.xlu0 %v756_v1  ;;  %80 = vmatpush.msra.mxu0 %v62_v2  ;;  %v42_v4 = vld [vmem:[%s857_s0] sm:$0xff]  ;;  %v60_v5 = vld [vmem:[#allocation4 + $0x8] sm:$0xff]  ;;  %v59_v6 = vld [vmem:[#allocation4] sm:$0xff]  ;;  %s758_s9 = smov 32   ;;  %vm64_vm4 = vcmask 261120   ;;  %s600_s14 = sshll.u32 %s863_s6, 4  ;;  %s601_s14 = int_to_ptr.hbm [resolvable:$true] %s600_s14 }
   0xb   :  { %144 = vmatpush.msra.mxu1 %v62_v2  ;;  %46 = vperm.xlu0 %633, %v42_v4   ;;  %v634_v8 = vld [vmem:[%s858_s1] ss:$0 sm:$0xff]  ;;  %s759_s1 = smov 64  }
   0xc   :  { %208 = vmatpush.msra.mxu2 %v62_v2  ;;  %81 = vmatpush.msra.mxu0 %v61_v3  ;;  %v635_v9 = vld [vmem:[%s860_s3] ss:$0 sm:$0xff] }
   0xd   :  { %145 = vmatpush.msra.mxu1 %v61_v3  ;;  %272 = vmatpush.msra.mxu3 %v62_v2 }
   0xe   :  { %209 = vmatpush.msra.mxu2 %v61_v3  ;;  %82 = vmatpush.msra.mxu0 %v60_v5 }
   0xf   :  { %146 = vmatpush.msra.mxu1 %v60_v5  ;;  %273 = vmatpush.msra.mxu3 %v61_v3 }
  0x10   :  { %210 = vmatpush.msra.mxu2 %v60_v5  ;;  %83 = vmatpush.msra.mxu0 %v59_v6 }
  0x11   :  { %147 = vmatpush.msra.mxu1 %v59_v6  ;;  %84 = vmatmul.f32.vlgmr.msra.gmra.mxu0 %v757_v7 }
  0x12   :  { %211 = vmatpush.msra.mxu2 %v59_v6  ;;  %274 = vmatpush.msra.mxu3 %v60_v5 }
  0x13   :  { %336 = vmatpush.msrb.mxu0 %v62_v2  ;;  %400 = vmatpush.msrb.mxu1 %v62_v2 }
  0x14   :  { %464 = vmatpush.msrb.mxu2 %v62_v2  ;;  %275 = vmatpush.msra.mxu3 %v59_v6 }
  0x15   :  { %337 = vmatpush.msrb.mxu0 %v61_v3  ;;  %401 = vmatpush.msrb.mxu1 %v61_v3 }
  0x16   :  { %465 = vmatpush.msrb.mxu2 %v61_v3  ;;  %528 = vmatpush.msrb.mxu3 %v62_v2 }
  0x17   :  { %338 = vmatpush.msrb.mxu0 %v60_v5  ;;  %402 = vmatpush.msrb.mxu1 %v60_v5 }
  0x18   :  { %466 = vmatpush.msrb.mxu2 %v60_v5  ;;  %529 = vmatpush.msrb.mxu3 %v61_v3 }
  0x19   :  { %339 = vmatpush.msrb.mxu0 %v59_v6  ;;  %403 = vmatpush.msrb.mxu1 %v59_v6 }
  0x1a   :  { %467 = vmatpush.msrb.mxu2 %v59_v6  ;;  %530 = vmatpush.msrb.mxu3 %v60_v5 }
  0x1c   :  { %531 = vmatpush.msrb.mxu3 %v59_v6 }
  0x7d   :  { %v47_v10 = vpop.permute.xlu0 %46 }
  0x7e   :  { %v52_v11 = vmul.f32 %v634_v8, %v47_v10 }
  0x80   :  { %v57_v12 = vadd.f32 %v635_v9, %v52_v11 }
  0x82   :  { %58 = vst [vmem:[#allocation2] sm:$0xff] %v57_v12 }
  0x89   :  { %v63_v13 = vld [vmem:[#allocation2] sm:$0x1]  ;;  %v126_v39 = vld [vmem:[#allocation2 + $0x1] sm:$0x1]  ;;  %v190_v1 = vld [vmem:[#allocation2 + $0x2] sm:$0x1] }
  0x8e   :  { %v85_v14 = vpop.f32.mrf.mxu0 }
  0x8f   :  { %v88_v15 = vadd.f32 %v85_v14, %v63_v13 }
  0x91   :  { %637 = vtanh.f32 %v88_v15  ;;  %v610_v17 = vmul.f32 -1.442695, %v88_v15 }
  0x93   :  { %639 = vpow2.f32 %v610_v17 }
  0x97   :  { %v638_v16 = vpop.eup %637 }
  0x98   :  { %111 = vrot.lane.b32.xlu0 %v638_v16, %s758_s9 }
  0x99   :  { %v640_v18 = vpop.eup %639 }
  0x9a   :  { %v92_v19 = vadd.f32 1.0, %v640_v18 }
  0x9c   :  { %641 = vrcp.f32 %v92_v19  ;;  %v104_v25 = vand.u32 2147483648, %v92_v19  ;;  %vm98_vm1 = vweird.f32 %v92_v19  ;;  %v102_v26 = vand.u32 2147483647, %v92_v19 }
  0x9e   :  { %v105_v28 = vor.u32 1.1754944e-38, %v104_v25  ;;  %vm103_vm3 = vcmp.eq.f32.partialorder %v102_v26, 8.507059e+37 }
  0xa2   :  { %v642_v20 = vpop.eup %641 }
  0xa3   :  { %v94_v21 = vmul.f32 %v642_v20, %v92_v19  ;;  %vm99_vm0 = vweird.f32 %v642_v20 }
  0xa4   :  { %vm100_vm2 = vmor %vm98_vm1, %vm99_vm0 }
  0xa5   :  { %v95_v22 = vsub.f32 1.0, %v94_v21 }
  0xa7   :  { %v96_v23 = vmul.f32 %v642_v20, %v95_v22 }
  0xa9   :  { %v97_v24 = vadd.f32 %v642_v20, %v96_v23 }
  0xab   :  { %v101_v27 = vsel %vm100_vm2, %v642_v20, %v97_v24 }
  0xac   :  { %v106_v30 = vsel %vm103_vm3, %v105_v28, %v101_v27  ;;  %v254_v27 = vld [vmem:[#allocation2 + $0x3] sm:$0x1] }
  0xad   :  { %v109_v32 = vmul.f32 0.0, %v106_v30 }
 0x10a   :  { %v112_v29 = vpop.permute.xlu0 %111 }
 0x10b   :  { %v114_v31 = vmul.f32 %v112_v29, %v106_v30 }
 0x10d   :  { %116 = vrot.lane.b32.xlu1 %v114_v31, %s758_s9 }
 0x17f   :  { %v117_v33 = vpop.permute.xlu1 %116 }
 0x180   :  { %v119_v34 = vadd.f32 %v117_v33, %v109_v32 }
 0x182   :  { %643 = vtanh.f32 %v119_v34 }
 0x188   :  { %v644_v35 = vpop.eup %643 }
 0x189   :  { %122 = vrot.lane.b32.xlu1 %v644_v35, %s758_s9 }
 0x1fb   :  { %v123_v36 = vpop.permute.xlu1 %122 }
 0x1fc   :  { %v125_v37 = vmul.f32 %v123_v36, %v106_v30 }
 0x1fe   :  { %128 = vrot.lane.b32.xlu2 %v125_v37, %s759_s1 }
 0x258   :  { %v129_v38 = vpop.permute.xlu2 %128 }
 0x259   :  { %611 = vmatmul.msk.f32.vlgmr.msra.gmra.mxu1 %vm64_vm4, %v129_v38 }
 0x2d6   :  { %v149_v40 = vpop.f32.mrf.mxu1 }
 0x2d7   :  { %v152_v41 = vadd.f32 %v149_v40, %v126_v39 }
 0x2d9   :  { %645 = vtanh.f32 %v152_v41  ;;  %v612_v43 = vmul.f32 -1.442695, %v152_v41 }
 0x2db   :  { %647 = vpow2.f32 %v612_v43 }
 0x2df   :  { %v646_v42 = vpop.eup %645 }
 0x2e0   :  { %175 = vrot.lane.b32.xlu2 %v646_v42, %s758_s9 }
 0x2e1   :  { %v648_v44 = vpop.eup %647 }
 0x2e2   :  { %v156_v45 = vadd.f32 1.0, %v648_v44 }
 0x2e4   :  { %649 = vrcp.f32 %v156_v45  ;;  %v168_v51 = vand.u32 2147483648, %v156_v45  ;;  %vm162_vm6 = vweird.f32 %v156_v45  ;;  %v166_v52 = vand.u32 2147483647, %v156_v45 }
 0x2e6   :  { %v169_v54 = vor.u32 1.1754944e-38, %v168_v51  ;;  %vm167_vm8 = vcmp.eq.f32.partialorder %v166_v52, 8.507059e+37 }
 0x2ea   :  { %v650_v46 = vpop.eup %649 }
 0x2eb   :  { %v158_v47 = vmul.f32 %v650_v46, %v156_v45  ;;  %vm163_vm5 = vweird.f32 %v650_v46 }
 0x2ec   :  { %vm164_vm7 = vmor %vm162_vm6, %vm163_vm5 }
 0x2ed   :  { %v159_v48 = vsub.f32 1.0, %v158_v47 }
 0x2ef   :  { %v160_v49 = vmul.f32 %v650_v46, %v159_v48 }
 0x2f1   :  { %v161_v50 = vadd.f32 %v650_v46, %v160_v49 }
 0x2f3   :  { %v165_v53 = vsel %vm164_vm7, %v650_v46, %v161_v50 }
 0x2f4   :  { %v170_v56 = vsel %vm167_vm8, %v169_v54, %v165_v53  ;;  %v318_v53 = vld [vmem:[#allocation2 + $0x4] sm:$0x1] }
 0x2f5   :  { %v173_v58 = vmul.f32 %v170_v56, %v119_v34 }
 0x33a   :  { %v176_v55 = vpop.permute.xlu2 %175 }
 0x33b   :  { %v178_v57 = vmul.f32 %v176_v55, %v170_v56 }
 0x33d   :  { %180 = vrot.lane.b32.xlu0 %v178_v57, %s758_s9 }
 0x3af   :  { %v181_v59 = vpop.permute.xlu0 %180 }
 0x3b0   :  { %v183_v60 = vadd.f32 %v181_v59, %v173_v58 }
 0x3b2   :  { %651 = vtanh.f32 %v183_v60 }
 0x3b8   :  { %v652_v61 = vpop.eup %651 }
 0x3b9   :  { %186 = vrot.lane.b32.xlu1 %v652_v61, %s758_s9 }
 0x42b   :  { %v187_v62 = vpop.permute.xlu1 %186 }
 0x42c   :  { %v189_v63 = vmul.f32 %v187_v62, %v170_v56 }
 0x42e   :  { %192 = vrot.lane.b32.xlu2 %v189_v63, %s759_s1 }
 0x488   :  { %v193_v0 = vpop.permute.xlu2 %192 }
 0x489   :  { %613 = vmatmul.msk.f32.vlgmr.msra.gmra.mxu2 %vm64_vm4, %v193_v0 }
 0x50c   :  { %v213_v2 = vpop.f32.mrf.mxu2 }
 0x50d   :  { %v216_v3 = vadd.f32 %v213_v2, %v190_v1 }
 0x50f   :  { %653 = vtanh.f32 %v216_v3  ;;  %v614_v5 = vmul.f32 -1.442695, %v216_v3 }
 0x511   :  { %655 = vpow2.f32 %v614_v5 }
 0x515   :  { %v654_v4 = vpop.eup %653 }
 0x516   :  { %239 = vrot.lane.b32.xlu0 %v654_v4, %s758_s9 }
 0x517   :  { %v656_v6 = vpop.eup %655 }
 0x518   :  { %v220_v7 = vadd.f32 1.0, %v656_v6 }
 0x51a   :  { %657 = vrcp.f32 %v220_v7  ;;  %v232_v13 = vand.u32 2147483648, %v220_v7  ;;  %vm226_vm10 = vweird.f32 %v220_v7  ;;  %v230_v14 = vand.u32 2147483647, %v220_v7 }
 0x51c   :  { %v233_v16 = vor.u32 1.1754944e-38, %v232_v13  ;;  %vm231_vm12 = vcmp.eq.f32.partialorder %v230_v14, 8.507059e+37 }
 0x520   :  { %v658_v8 = vpop.eup %657 }
 0x521   :  { %v222_v9 = vmul.f32 %v658_v8, %v220_v7  ;;  %vm227_vm9 = vweird.f32 %v658_v8 }
 0x522   :  { %vm228_vm11 = vmor %vm226_vm10, %vm227_vm9 }
 0x523   :  { %v223_v10 = vsub.f32 1.0, %v222_v9 }
 0x525   :  { %v224_v11 = vmul.f32 %v658_v8, %v223_v10 }
 0x527   :  { %v225_v12 = vadd.f32 %v658_v8, %v224_v11 }
 0x529   :  { %v229_v15 = vsel %vm228_vm11, %v658_v8, %v225_v12 }
 0x52a   :  { %v234_v18 = vsel %vm231_vm12, %v233_v16, %v229_v15  ;;  %v382_v15 = vld [vmem:[#allocation2 + $0x5] sm:$0x1] }
 0x52b   :  { %v237_v20 = vmul.f32 %v234_v18, %v183_v60 }
 0x588   :  { %v240_v17 = vpop.permute.xlu0 %239 }
 0x589   :  { %v242_v19 = vmul.f32 %v240_v17, %v234_v18 }
 0x58b   :  { %244 = vrot.lane.b32.xlu1 %v242_v19, %s758_s9 }
 0x5fd   :  { %v245_v21 = vpop.permute.xlu1 %244 }
 0x5fe   :  { %v247_v22 = vadd.f32 %v245_v21, %v237_v20 }
 0x600   :  { %659 = vtanh.f32 %v247_v22 }
 0x606   :  { %v660_v23 = vpop.eup %659 }
 0x607   :  { %250 = vrot.lane.b32.xlu2 %v660_v23, %s758_s9 }
 0x661   :  { %v251_v24 = vpop.permute.xlu2 %250 }
 0x662   :  { %v253_v25 = vmul.f32 %v251_v24, %v234_v18 }
 0x664   :  { %256 = vrot.lane.b32.xlu0 %v253_v25, %s759_s1 }
 0x6d6   :  { %v257_v26 = vpop.permute.xlu0 %256 }
 0x6d7   :  { %615 = vmatmul.msk.f32.vlgmr.msra.gmra.mxu3 %vm64_vm4, %v257_v26 }
 0x75a   :  { %v277_v28 = vpop.f32.mrf.mxu3 }
 0x75b   :  { %v280_v29 = vadd.f32 %v277_v28, %v254_v27 }
 0x75d   :  { %661 = vtanh.f32 %v280_v29  ;;  %v616_v31 = vmul.f32 -1.442695, %v280_v29 }
 0x75f   :  { %663 = vpow2.f32 %v616_v31 }
 0x763   :  { %v662_v30 = vpop.eup %661 }
 0x764   :  { %303 = vrot.lane.b32.xlu1 %v662_v30, %s758_s9 }
 0x765   :  { %v664_v32 = vpop.eup %663 }
 0x766   :  { %v284_v33 = vadd.f32 1.0, %v664_v32 }
 0x768   :  { %665 = vrcp.f32 %v284_v33  ;;  %v296_v39 = vand.u32 2147483648, %v284_v33  ;;  %vm290_vm14 = vweird.f32 %v284_v33  ;;  %v294_v40 = vand.u32 2147483647, %v284_v33 }
 0x76a   :  { %v297_v42 = vor.u32 1.1754944e-38, %v296_v39  ;;  %vm295_vm0 = vcmp.eq.f32.partialorder %v294_v40, 8.507059e+37 }
 0x76e   :  { %v666_v34 = vpop.eup %665 }
 0x76f   :  { %v286_v35 = vmul.f32 %v666_v34, %v284_v33  ;;  %vm291_vm13 = vweird.f32 %v666_v34 }
 0x770   :  { %vm292_vm15 = vmor %vm290_vm14, %vm291_vm13 }
 0x771   :  { %v287_v36 = vsub.f32 1.0, %v286_v35 }
 0x773   :  { %v288_v37 = vmul.f32 %v666_v34, %v287_v36 }
 0x775   :  { %v289_v38 = vadd.f32 %v666_v34, %v288_v37 }
 0x777   :  { %v293_v41 = vsel %vm292_vm15, %v666_v34, %v289_v38 }
 0x778   :  { %v298_v44 = vsel %vm295_vm0, %v297_v42, %v293_v41  ;;  %v446_v41 = vld [vmem:[#allocation2 + $0x6] sm:$0x1] }
 0x779   :  { %v301_v46 = vmul.f32 %v298_v44, %v247_v22 }
 0x7d6   :  { %v304_v43 = vpop.permute.xlu1 %303 }
 0x7d7   :  { %v306_v45 = vmul.f32 %v304_v43, %v298_v44 }
 0x7d9   :  { %308 = vrot.lane.b32.xlu2 %v306_v45, %s758_s9 }
 0x833   :  { %v309_v47 = vpop.permute.xlu2 %308 }
 0x834   :  { %v311_v48 = vadd.f32 %v309_v47, %v301_v46 }
 0x836   :  { %667 = vtanh.f32 %v311_v48 }
 0x83c   :  { %v668_v49 = vpop.eup %667 }
 0x83d   :  { %314 = vrot.lane.b32.xlu0 %v668_v49, %s758_s9 }
 0x8af   :  { %v315_v50 = vpop.permute.xlu0 %314 }
 0x8b0   :  { %v317_v51 = vmul.f32 %v315_v50, %v298_v44 }
 0x8b2   :  { %320 = vrot.lane.b32.xlu1 %v317_v51, %s759_s1 }
 0x924   :  { %v321_v52 = vpop.permute.xlu1 %320 }
 0x925   :  { %617 = vmatmul.msk.f32.vlgmr.msrb.gmra.mxu0 %vm64_vm4, %v321_v52 }
 0x9a2   :  { %v341_v54 = vpop.f32.mrf.mxu0 }
 0x9a3   :  { %v344_v55 = vadd.f32 %v341_v54, %v318_v53 }
 0x9a5   :  { %669 = vtanh.f32 %v344_v55  ;;  %v618_v57 = vmul.f32 -1.442695, %v344_v55 }
 0x9a7   :  { %671 = vpow2.f32 %v618_v57 }
 0x9ab   :  { %v670_v56 = vpop.eup %669 }
 0x9ac   :  { %367 = vrot.lane.b32.xlu2 %v670_v56, %s758_s9 }
 0x9ad   :  { %v672_v58 = vpop.eup %671 }
 0x9ae   :  { %v348_v59 = vadd.f32 1.0, %v672_v58 }
 0x9b0   :  { %673 = vrcp.f32 %v348_v59  ;;  %v360_v1 = vand.u32 2147483648, %v348_v59  ;;  %vm354_vm2 = vweird.f32 %v348_v59  ;;  %v358_v2 = vand.u32 2147483647, %v348_v59 }
 0x9b2   :  { %v361_v4 = vor.u32 1.1754944e-38, %v360_v1  ;;  %vm359_vm5 = vcmp.eq.f32.partialorder %v358_v2, 8.507059e+37 }
 0x9b6   :  { %v674_v60 = vpop.eup %673 }
 0x9b7   :  { %v350_v61 = vmul.f32 %v674_v60, %v348_v59  ;;  %vm355_vm1 = vweird.f32 %v674_v60 }
 0x9b8   :  { %vm356_vm3 = vmor %vm354_vm2, %vm355_vm1  ;;  %vm585_vm1 = vcmask 253952   ;;  %vm591_vm2 = vcmask 0  }
 0x9b9   :  { %v351_v62 = vsub.f32 1.0, %v350_v61 }
 0x9bb   :  { %v352_v63 = vmul.f32 %v674_v60, %v351_v62 }
 0x9bd   :  { %v353_v0 = vadd.f32 %v674_v60, %v352_v63 }
 0x9bf   :  { %v357_v3 = vsel %vm356_vm3, %v674_v60, %v353_v0 }
 0x9c0   :  { %v362_v6 = vsel %vm359_vm5, %v361_v4, %v357_v3  ;;  %v510_v3 = vld [vmem:[#allocation2 + $0x7] sm:$0x1] }
 0x9c1   :  { %v365_v8 = vmul.f32 %v362_v6, %v311_v48 }
 0xa06   :  { %v368_v5 = vpop.permute.xlu2 %367 }
 0xa07   :  { %v370_v7 = vmul.f32 %v368_v5, %v362_v6 }
 0xa09   :  { %372 = vrot.lane.b32.xlu0 %v370_v7, %s758_s9 }
 0xa7b   :  { %v373_v9 = vpop.permute.xlu0 %372 }
 0xa7c   :  { %v375_v10 = vadd.f32 %v373_v9, %v365_v8 }
 0xa7e   :  { %675 = vtanh.f32 %v375_v10 }
 0xa84   :  { %v676_v11 = vpop.eup %675 }
 0xa85   :  { %378 = vrot.lane.b32.xlu1 %v676_v11, %s758_s9 }
 0xaf7   :  { %v379_v12 = vpop.permute.xlu1 %378 }
 0xaf8   :  { %v381_v13 = vmul.f32 %v379_v12, %v362_v6 }
 0xafa   :  { %384 = vrot.lane.b32.xlu2 %v381_v13, %s759_s1 }
 0xb54   :  { %v385_v14 = vpop.permute.xlu2 %384 }
 0xb55   :  { %619 = vmatmul.msk.f32.vlgmr.msrb.gmra.mxu1 %vm64_vm4, %v385_v14 }
 0xbd2   :  { %v405_v16 = vpop.f32.mrf.mxu1 }
 0xbd3   :  { %v408_v17 = vadd.f32 %v405_v16, %v382_v15 }
 0xbd5   :  { %677 = vtanh.f32 %v408_v17  ;;  %v620_v19 = vmul.f32 -1.442695, %v408_v17 }
 0xbd7   :  { %679 = vpow2.f32 %v620_v19 }
 0xbdb   :  { %v678_v18 = vpop.eup %677 }
 0xbdc   :  { %431 = vrot.lane.b32.xlu0 %v678_v18, %s758_s9 }
 0xbdd   :  { %v680_v20 = vpop.eup %679 }
 0xbde   :  { %v412_v21 = vadd.f32 1.0, %v680_v20 }
 0xbe0   :  { %681 = vrcp.f32 %v412_v21  ;;  %v424_v27 = vand.u32 2147483648, %v412_v21  ;;  %vm418_vm7 = vweird.f32 %v412_v21  ;;  %v422_v28 = vand.u32 2147483647, %v412_v21 }
 0xbe2   :  { %v425_v30 = vor.u32 1.1754944e-38, %v424_v27  ;;  %vm423_vm9 = vcmp.eq.f32.partialorder %v422_v28, 8.507059e+37 }
 0xbe6   :  { %v682_v22 = vpop.eup %681 }
 0xbe7   :  { %v414_v23 = vmul.f32 %v682_v22, %v412_v21  ;;  %vm419_vm6 = vweird.f32 %v682_v22 }
 0xbe8   :  { %vm420_vm8 = vmor %vm418_vm7, %vm419_vm6 }
 0xbe9   :  { %v415_v24 = vsub.f32 1.0, %v414_v23 }
 0xbeb   :  { %v416_v25 = vmul.f32 %v682_v22, %v415_v24 }
 0xbed   :  { %v417_v26 = vadd.f32 %v682_v22, %v416_v25 }
 0xbef   :  { %v421_v29 = vsel %vm420_vm8, %v682_v22, %v417_v26  ;;  %v636_v22 = vld [vmem:[%s861_s4] ss:$0 sm:$0xff]  ;;  %s760_s4 = smov [#allocation7]  }
 0xbf0   :  { %v426_v32 = vsel %vm423_vm9, %v425_v30, %v421_v29  ;;  %s598_s11 = sshll.u32 %s760_s4, 4  ;;  %s599_s11 = int_to_ptr.vmem [resolvable:$true] %s598_s11 }
 0xbf1   :  { %v429_v34 = vmul.f32 %v426_v32, %v375_v10 }
 0xc4e   :  { %v432_v31 = vpop.permute.xlu0 %431 }
 0xc4f   :  { %v434_v33 = vmul.f32 %v432_v31, %v426_v32 }
 0xc51   :  { %436 = vrot.lane.b32.xlu1 %v434_v33, %s758_s9  ;;  %v589_v33 = vld [vmem:[#allocation3] sm:$0x1] }
 0xcc3   :  { %v437_v35 = vpop.permute.xlu1 %436 }
 0xcc4   :  { %v439_v36 = vadd.f32 %v437_v35, %v429_v34 }
 0xcc6   :  { %683 = vtanh.f32 %v439_v36 }
 0xccc   :  { %v684_v37 = vpop.eup %683 }
 0xccd   :  { %442 = vrot.lane.b32.xlu2 %v684_v37, %s758_s9 }
 0xd27   :  { %v443_v38 = vpop.permute.xlu2 %442 }
 0xd28   :  { %v445_v39 = vmul.f32 %v443_v38, %v426_v32 }
 0xd2a   :  { %448 = vrot.lane.b32.xlu0 %v445_v39, %s759_s1 }
 0xd9c   :  { %v449_v40 = vpop.permute.xlu0 %448 }
 0xd9d   :  { %621 = vmatmul.msk.f32.vlgmr.msrb.gmra.mxu2 %vm64_vm4, %v449_v40 }
 0xe20   :  { %v469_v42 = vpop.f32.mrf.mxu2 }
 0xe21   :  { %v472_v43 = vadd.f32 %v469_v42, %v446_v41 }
 0xe23   :  { %685 = vtanh.f32 %v472_v43  ;;  %v622_v45 = vmul.f32 -1.442695, %v472_v43 }
 0xe25   :  { %687 = vpow2.f32 %v622_v45 }
 0xe29   :  { %v686_v44 = vpop.eup %685 }
 0xe2a   :  { %495 = vrot.lane.b32.xlu1 %v686_v44, %s758_s9 }
 0xe2b   :  { %v688_v46 = vpop.eup %687 }
 0xe2c   :  { %v476_v47 = vadd.f32 1.0, %v688_v46 }
 0xe2e   :  { %689 = vrcp.f32 %v476_v47  ;;  %v488_v53 = vand.u32 2147483648, %v476_v47  ;;  %vm482_vm11 = vweird.f32 %v476_v47  ;;  %v486_v54 = vand.u32 2147483647, %v476_v47 }
 0xe30   :  { %v489_v56 = vor.u32 1.1754944e-38, %v488_v53  ;;  %vm487_vm13 = vcmp.eq.f32.partialorder %v486_v54, 8.507059e+37 }
 0xe34   :  { %v690_v48 = vpop.eup %689 }
 0xe35   :  { %v478_v49 = vmul.f32 %v690_v48, %v476_v47  ;;  %vm483_vm10 = vweird.f32 %v690_v48 }
 0xe36   :  { %vm484_vm12 = vmor %vm482_vm11, %vm483_vm10 }
 0xe37   :  { %v479_v50 = vsub.f32 1.0, %v478_v49 }
 0xe39   :  { %v480_v51 = vmul.f32 %v690_v48, %v479_v50 }
 0xe3b   :  { %v481_v52 = vadd.f32 %v690_v48, %v480_v51 }
 0xe3d   :  { %v485_v55 = vsel %vm484_vm12, %v690_v48, %v481_v52 }
 0xe3e   :  { %v490_v58 = vsel %vm487_vm13, %v489_v56, %v485_v55 }
 0xe3f   :  { %v493_v60 = vmul.f32 %v490_v58, %v439_v36 }
 0xe9c   :  { %v496_v57 = vpop.permute.xlu1 %495 }
 0xe9d   :  { %v498_v59 = vmul.f32 %v496_v57, %v490_v58 }
 0xe9f   :  { %500 = vrot.lane.b32.xlu2 %v498_v59, %s758_s9 }
 0xef9   :  { %v501_v61 = vpop.permute.xlu2 %500 }
 0xefa   :  { %v503_v62 = vadd.f32 %v501_v61, %v493_v60 }
 0xefc   :  { %691 = vtanh.f32 %v503_v62 }
 0xf02   :  { %v692_v63 = vpop.eup %691 }
 0xf03   :  { %506 = vrot.lane.b32.xlu0 %v692_v63, %s758_s9 }
 0xf75   :  { %v507_v0 = vpop.permute.xlu0 %506 }
 0xf76   :  { %v509_v1 = vmul.f32 %v507_v0, %v490_v58 }
 0xf78   :  { %512 = vrot.lane.b32.xlu1 %v509_v1, %s759_s1 }
 0xfea   :  { %v513_v2 = vpop.permute.xlu1 %512 }
 0xfeb   :  { %623 = vmatmul.msk.f32.vlgmr.msrb.gmra.mxu3 %vm64_vm4, %v513_v2 }
0x106e   :  { %v533_v4 = vpop.f32.mrf.mxu3 }
0x106f   :  { %v536_v5 = vadd.f32 %v533_v4, %v510_v3 }
0x1071   :  { %693 = vtanh.f32 %v536_v5  ;;  %v624_v7 = vmul.f32 -1.442695, %v536_v5 }
0x1073   :  { %695 = vpow2.f32 %v624_v7 }
0x1077   :  { %v694_v6 = vpop.eup %693 }
0x1078   :  { %559 = vrot.lane.b32.xlu2 %v694_v6, %s758_s9 }
0x1079   :  { %v696_v8 = vpop.eup %695 }
0x107a   :  { %v540_v9 = vadd.f32 1.0, %v696_v8 }
0x107c   :  { %697 = vrcp.f32 %v540_v9  ;;  %v552_v15 = vand.u32 2147483648, %v540_v9  ;;  %vm546_vm4 = vweird.f32 %v540_v9  ;;  %v550_v16 = vand.u32 2147483647, %v540_v9 }
0x107e   :  { %v553_v18 = vor.u32 1.1754944e-38, %v552_v15  ;;  %vm551_vm0 = vcmp.eq.f32.partialorder %v550_v16, 8.507059e+37 }
0x1080   :  { %577 = vrot.lane.b32.xlu2 %v636_v22, %s759_s1 }
0x1082   :  { %v698_v10 = vpop.eup %697 }
0x1083   :  { %v542_v11 = vmul.f32 %v698_v10, %v540_v9  ;;  %vm547_vm14 = vweird.f32 %v698_v10 }
0x1084   :  { %vm548_vm15 = vmor %vm546_vm4, %vm547_vm14 }
0x1085   :  { %v543_v12 = vsub.f32 1.0, %v542_v11 }
0x1087   :  { %v544_v13 = vmul.f32 %v698_v10, %v543_v12 }
0x1089   :  { %v545_v14 = vadd.f32 %v698_v10, %v544_v13 }
0x108b   :  { %v549_v17 = vsel %vm548_vm15, %v698_v10, %v545_v14 }
0x108c   :  { %v554_v20 = vsel %vm551_vm0, %v553_v18, %v549_v17 }
0x108d   :  { %v557_v23 = vmul.f32 %v554_v20, %v503_v62 }
0x10d2   :  { %v560_v19 = vpop.permute.xlu2 %559 }
0x10d3   :  { %v562_v21 = vmul.f32 %v560_v19, %v554_v20 }
0x10d5   :  { %564 = vrot.lane.b32.xlu0 %v562_v21, %s758_s9 }
0x10da   :  { %v578_v28 = vpop.permute.xlu2 %577 }
0x1147   :  { %v565_v24 = vpop.permute.xlu0 %564 }
0x1148   :  { %v567_v25 = vadd.f32 %v565_v24, %v557_v23 }
0x114a   :  { %699 = vtanh.f32 %v567_v25 }
0x1150   :  { %v700_v26 = vpop.eup %699 }
0x1151   :  { %570 = vrot.lane.b32.xlu1 %v700_v26, %s758_s9 }
0x11c3   :  { %v571_v27 = vpop.permute.xlu1 %570 }
0x11c4   :  { %v573_v29 = vmul.f32 %v571_v27, %v554_v20 }
0x11c6   :  { %v580_v30 = vmul.f32 %v578_v28, %v573_v29 }
0x11c8   :  { %582 = vrot.lane.b32.xlu0 %v580_v30, %s759_s1 }
0x123a   :  { %v583_v31 = vpop.permute.xlu0 %582 }
0x123b   :  { %v586_v32 = vsel %vm585_vm1, %v583_v31, 0.0 }
0x123c   :  { %587 = vadd.xlane.f32.xlu1 %v586_v32 }
0x12af   :  { %v588_v34 = vpop.xlane.xlu1 %587 }
0x12b0   :  { %v590_v35 = vadd.f32 %v589_v33, %v588_v34 }
0x12b2   :  { %592 = vst.msk [vmem:[#allocation7] sm:$0x1] %vm591_vm2, %v590_v35 }
0x12b3   :  { %603 = dma.vmem_to_hbm [thread:$0]  %s599_s11, 16, %s601_s14, [#allocation6]  }
0x12b4   :  { %751 = dma.done.wait [#allocation6], 16  }
0x12b5   :  { %752 = vsyncadd [#allocation6], 4294967280 }
0x12b6   :  { %608 = vsyncpa [#allocation5], 1 }
0x12b7   :  { %609 = vsyncpa [#allocation6], 1 }

</bundles_post_ra>
